<compile_context>
chip_gen: v7x
topology: tpu7x:2x2x1
jax: 0.10.0
libtpu: 0.0.40
codegen_flags: <defaults>
</compile_context>

<pallas_src>
import jax
import jax.numpy as jnp
from jax.experimental import pallas as pl
from jax.experimental.pallas import tpu as pltpu


# ----------------------------------------------------------------------------
# Kernels
# ----------------------------------------------------------------------------

def _ffn_kernel_resident(x_ref, w1_ref, b1_ref, w2_ref, b2_ref, g_ref, bt_ref,
                         o_ref):
    """Weight-resident path: full W1/W2 live in VMEM, grid is rows only."""
    x = x_ref[...]                                   # keep operand dtype for MXU
    h = jnp.dot(x, w1_ref[...], preferred_element_type=jnp.float32)
    h = jnp.maximum(h + b1_ref[...].astype(jnp.float32), 0.0)          # ReLU
    y = jnp.dot(h.astype(w2_ref.dtype), w2_ref[...],
                preferred_element_type=jnp.float32)
    # bias + residual (f32), then LayerNorm over channel dim (PyTorch eps=1e-5)
    y = y + b2_ref[...].astype(jnp.float32) + x.astype(jnp.float32)
    mean = jnp.mean(y, axis=-1, keepdims=True)
    var = jnp.mean((y - mean) ** 2, axis=-1, keepdims=True)
    norm = (y - mean) * jax.lax.rsqrt(var + 1e-5)    # rsqrt -> EUP slot
    o_ref[...] = (norm * g_ref[...].astype(jnp.float32)
                  + bt_ref[...].astype(jnp.float32)).astype(o_ref.dtype)


def _ffn_kernel_tiled(x_ref, w1_ref, b1_ref, w2_ref, b2_ref, g_ref, bt_ref,
                      o_ref, acc_ref):
    """H-tiled path: k (hidden-dim tile) is the inner reduction grid axis."""
    k = pl.program_id(1)

    @pl.when(k == 0)
    def _init():
        acc_ref[...] = jnp.zeros_like(acc_ref)

    # ---- hot path: one H-tile of the FFN --------------------------------
    x = x_ref[...]
    h = jnp.dot(x, w1_ref[...], preferred_element_type=jnp.float32)
    h = jnp.maximum(h + b1_ref[...].astype(jnp.float32), 0.0)
    acc_ref[...] += jnp.dot(h.astype(w2_ref.dtype), w2_ref[...],
                            preferred_element_type=jnp.float32)

    # ---- epilogue: bias, residual, LayerNorm (last H-tile only) ----------
    @pl.when(k == pl.num_programs(1) - 1)
    def _finalize():
        # NOTE: reusing `x` from the hot path is only correct because the x
        # block index is constant in k (index_map (i, 0)); keep it that way.
        b2 = b2_ref[...].astype(jnp.float32)
        g = g_ref[...].astype(jnp.float32)
        bt = bt_ref[...].astype(jnp.float32)
        y = acc_ref[...] + b2 + x.astype(jnp.float32)
        mean = jnp.mean(y, axis=-1, keepdims=True)
        var = jnp.mean((y - mean) ** 2, axis=-1, keepdims=True)
        norm = (y - mean) * jax.lax.rsqrt(var + 1e-5)
        o_ref[...] = (norm * g + bt).astype(o_ref.dtype)


# ----------------------------------------------------------------------------
# Wrapper
# ----------------------------------------------------------------------------

def _round_up(n, m):
    return (n + m - 1) // m * m


def _sublane_min(dtype):
    # packed sublane minimum: 8 for 32-bit, 16 for 16-bit, 32 for 8-bit dtypes
    return max(8, 32 // jnp.dtype(dtype).itemsize)


def _vmem_capacity_bytes():
    try:
        return int(pltpu.get_tpu_info().vmem_capacity_bytes)
    except Exception:
        return 64 * 1024 * 1024  # conservative fallback (v7x per-TC VMEM)


def positionwise_feed_forward(x, w1, b1, w2, b2, gamma, beta, *,
                              tm=None, th=None):
    """x: (B, L, C).  w1: (C, H), b1: (H,), w2: (H, C), b2: (C,),
    gamma/beta: (C,).  Returns (B, L, C).

    Conv1d weights must be passed already transposed to their per-position
    linear form: W1 = conv1.weight[:, :, 0].T (C, H), W2 = conv2.weight[:, :, 0].T (H, C).
    """
    B, L, C = x.shape
    H = w1.shape[1]
    M = B * L
    itemsize = jnp.dtype(x.dtype).itemsize
    w_itemsize = jnp.dtype(w1.dtype).itemsize
    sub = _sublane_min(x.dtype)
    vmem_cap = _vmem_capacity_bytes()

    # ---- weight-resident vs H-tiled decision (per-generation VMEM budget) ---
    # single-buffered weights + b1 + (b2, gamma, beta)
    weight_bytes = (C * H + H * C + H) * w_itemsize + 3 * C * itemsize
    act_bytes_guess = 4 * 512 * C * itemsize          # x + out, double-buffered
    weights_resident = (weight_bytes + act_bytes_guess + (8 << 20)
                        <= int(0.75 * vmem_cap))

    # ---- row tiling -----------------------------------------------------
    if tm is None:
        # resident: activations are the only HBM traffic, 512 is plenty;
        # tiled: arithmetic intensity ~= tm flops / weight byte, 768 clears the
        # v6e (~650), v7x (~310) and v5e (~240) rooflines with margin.
        tm = 512 if weights_resident else 768
    tm = _round_up(tm, sub)
    tm_eff = min(tm, _round_up(M, sub))
    n_row_tiles = _round_up(M, tm_eff) // tm_eff
    if n_row_tiles < 2 and M > sub:
        # give both v7x TensorCores a row tile (megacore "parallel" sharding)
        tm_eff = _round_up((M + 1) // 2, sub)
    Mp = _round_up(M, tm_eff)
    n_row_tiles = Mp // tm_eff

    x2 = x.reshape(M, C)
    if Mp != M:
        x2 = jnp.pad(x2, ((0, Mp - M), (0, 0)))

    b2_2 = b2.reshape(1, C)
    g_2 = gamma.reshape(1, C)
    bt_2 = beta.reshape(1, C)

    if weights_resident:
        # ------------------------------------------------------------------
        # Fast path: full weights stay in VMEM, DMA'd from HBM exactly once.
        # ------------------------------------------------------------------
        b1_2 = b1.reshape(1, H)
        footprint = weight_bytes + 4 * tm_eff * C * itemsize
        vmem_limit = max(32 << 20,
                         min(int(0.9 * vmem_cap), footprint + (16 << 20)))
        cost = pl.CostEstimate(
            flops=4 * M * H * C + 10 * M * C,
            transcendentals=M,
            bytes_accessed=2 * M * C * itemsize + weight_bytes)

        def const_spec(shape):
            # block index never changes -> single-buffer (halves VMEM footprint)
            return pl.BlockSpec(shape, lambda i: (0, 0),
                                pipeline_mode=pl.Buffered(1))

        out2 = pl.pallas_call(
            _ffn_kernel_resident,
            out_shape=jax.ShapeDtypeStruct((Mp, C), x.dtype),
            grid_spec=pltpu.PrefetchScalarGridSpec(
                num_scalar_prefetch=0,
                grid=(n_row_tiles,),
                in_specs=[
                    pl.BlockSpec((tm_eff, C), lambda i: (i, 0)),   # x tile
                    const_spec((C, H)),                            # W1 (resident)
                    const_spec((1, H)),                            # b1
                    const_spec((H, C)),                            # W2 (resident)
                    const_spec((1, C)),                            # b2
                    const_spec((1, C)),                            # gamma
                    const_spec((1, C)),                            # beta
                ],
                out_specs=pl.BlockSpec((tm_eff, C), lambda i: (i, 0)),
            ),
            compiler_params=pltpu.CompilerParams(
                dimension_semantics=("parallel",),
                vmem_limit_bytes=vmem_limit,
            ),
            cost_estimate=cost,
        )(x2, w1, b1_2, w2, b2_2, g_2, bt_2)

    else:
        # ------------------------------------------------------------------
        # Fallback: tile the hidden dim H (reduction axis, f32 accumulator).
        # ------------------------------------------------------------------
        if th is None:
            th = 512
            for cand in (1024, 768, 512, 384, 256):
                if H % cand == 0:
                    th = cand           # divides H -> no weight padding needed
                    break
        th = max(128, _round_up(th, 128))
        Hp = _round_up(H, th)

        w1p, b1p, w2p = w1, b1, w2
        if Hp != H:
            # Zero padding is exact: relu(x@0 + 0) = 0 contributes nothing.
            # TODO(synk): pad the weights once at model init instead of per call.
            w1p = jnp.pad(w1, ((0, 0), (0, Hp - H)))
            b1p = jnp.pad(b1, ((0, Hp - H),))
            w2p = jnp.pad(w2, ((0, Hp - H), (0, 0)))
        b1_2 = b1p.reshape(1, Hp)
        n_h_tiles = Hp // th

        footprint = (4 * tm_eff * C * itemsize                       # x + out x2
                     + 2 * (C * th + th * C + th) * w_itemsize       # W1/W2/b1 x2
                     + 3 * C * itemsize                               # consts
                     + tm_eff * C * 4)                                # f32 acc
        vmem_limit = max(32 << 20,
                         min(int(0.9 * vmem_cap), footprint + (16 << 20)))
        cost = pl.CostEstimate(
            flops=4 * M * Hp * C + 10 * M * C,
            transcendentals=M,
            bytes_accessed=(2 * M * C * itemsize
                            + n_row_tiles * (C * Hp + Hp * C + Hp) * w_itemsize))

        out2 = pl.pallas_call(
            _ffn_kernel_tiled,
            out_shape=jax.ShapeDtypeStruct((Mp, C), x.dtype),
            grid_spec=pltpu.PrefetchScalarGridSpec(
                num_scalar_prefetch=0,
                grid=(n_row_tiles, n_h_tiles),
                in_specs=[
                    pl.BlockSpec((tm_eff, C), lambda i, k: (i, 0)),   # x tile
                    pl.BlockSpec((C, th), lambda i, k: (0, k)),       # W1 H-tile
                    pl.BlockSpec((1, th), lambda i, k: (0, k)),       # b1 H-tile
                    pl.BlockSpec((th, C), lambda i, k: (k, 0)),       # W2 H-tile
                    pl.BlockSpec((1, C), lambda i, k: (0, 0),
                                 pipeline_mode=pl.Buffered(1)),        # b2
                    pl.BlockSpec((1, C), lambda i, k: (0, 0),
                                 pipeline_mode=pl.Buffered(1)),        # gamma
                    pl.BlockSpec((1, C), lambda i, k: (0, 0),
                                 pipeline_mode=pl.Buffered(1)),        # beta
                ],
                out_specs=pl.BlockSpec((tm_eff, C), lambda i, k: (i, 0)),
                scratch_shapes=[pltpu.VMEM((tm_eff, C), jnp.float32)],
            ),
            compiler_params=pltpu.CompilerParams(
                dimension_semantics=("parallel", "arbitrary"),
                vmem_limit_bytes=vmem_limit,
            ),
            cost_estimate=cost,
        )(x2, w1p, b1_2, w2p, b2_2, g_2, bt_2)

    if Mp != M:
        out2 = out2[:M]
    return out2.reshape(B, L, C)


# ----------------------------------------------------------------------------
# Demo / correctness check
# ----------------------------------------------------------------------------

if __name__ == "__main__":
    # Small shapes consistent with the module: batch=2, seq=8, in_dim=16, hidden=32
    B, L, C, H = 2, 8, 16, 32

    key = jax.random.PRNGKey(0)
    kx, k1, kb1, k2, kb2 = jax.random.split(key, 5)

    x = jax.random.normal(kx, (B, L, C), dtype=jnp.float32)

    # Conv1d(in_dim, hidden_dim, 1) weight has shape (H, C, 1) in PyTorch;
    # stored here in per-position-linear form: (C, H) / (H, C).
    w1 = jax.random.normal(k1, (C, H), dtype=jnp.float32) * 0.1
    b1 = jax.random.normal(kb1, (H,), dtype=jnp.float32) * 0.1
    w2 = jax.random.normal(k2, (H, C), dtype=jnp.float32) * 0.1
    b2 = jax.random.normal(kb2, (C,), dtype=jnp.float32) * 0.1
    gamma = jnp.ones((C,), dtype=jnp.float32)
    beta = jnp.zeros((C,), dtype=jnp.float32)

    out = positionwise_feed_forward(x, w1, b1, w2, b2, gamma, beta)
    jax.block_until_ready(out)

    # Reference in plain JAX (same math, dropout = identity / eval mode)
    h_ref = jnp.maximum(x @ w1 + b1, 0.0)
    y_ref = h_ref @ w2 + b2 + x
    mu = y_ref.mean(-1, keepdims=True)
    var = ((y_ref - mu) ** 2).mean(-1, keepdims=True)
    ref = (y_ref - mu) / jnp.sqrt(var + 1e-5) * gamma + beta
    assert out.shape == (B, L, C)
    assert jnp.allclose(out, ref, atol=1e-5, rtol=1e-5)

    print("KERNEL_OK")
</pallas_src>

<mosaic_0001>
module attributes {stable_mosaic.version = 11 : i64} {
  func.func @_ffn_kernel_resident(%arg0: i32, %arg1: memref<8x16xf32, #tpu.memory_space<vmem>>, %arg2: memref<16x32xf32, #tpu.memory_space<vmem>>, %arg3: memref<1x32xf32, #tpu.memory_space<vmem>>, %arg4: memref<32x16xf32, #tpu.memory_space<vmem>>, %arg5: memref<1x16xf32, #tpu.memory_space<vmem>>, %arg6: memref<1x16xf32, #tpu.memory_space<vmem>>, %arg7: memref<1x16xf32, #tpu.memory_space<vmem>>, %arg8: memref<8x16xf32, #tpu.memory_space<vmem>>) attributes {dimension_semantics = [#tpu.dimension_semantics<parallel>], iteration_bounds = array<i64: 2>, scalar_prefetch = 0 : i64, scratch_operands = 0 : i64, tpu.core_type = #tpu.core_type<tc>, window_params = [{transform_indices = @transform_0, window_bounds = array<i64: 8, 16>}, {pipeline_mode = #tpu.pipeline_mode<synchronous>, transform_indices = @transform_1, window_bounds = array<i64: 16, 32>}, {pipeline_mode = #tpu.pipeline_mode<synchronous>, transform_indices = @transform_2, window_bounds = array<i64: 1, 32>}, {pipeline_mode = #tpu.pipeline_mode<synchronous>, transform_indices = @transform_3, window_bounds = array<i64: 32, 16>}, {pipeline_mode = #tpu.pipeline_mode<synchronous>, transform_indices = @transform_4, window_bounds = array<i64: 1, 16>}, {pipeline_mode = #tpu.pipeline_mode<synchronous>, transform_indices = @transform_5, window_bounds = array<i64: 1, 16>}, {pipeline_mode = #tpu.pipeline_mode<synchronous>, transform_indices = @transform_6, window_bounds = array<i64: 1, 16>}, {transform_indices = @transform_7, window_bounds = array<i64: 8, 16>}]} {
    %c0 = arith.constant 0 : index
    %c0_0 = arith.constant 0 : index
    %0 = vector.load %arg1[%c0, %c0_0] : memref<8x16xf32, #tpu.memory_space<vmem>>, vector<8x16xf32>
    %c0_1 = arith.constant 0 : index
    %c0_2 = arith.constant 0 : index
    %1 = vector.load %arg2[%c0_1, %c0_2] : memref<16x32xf32, #tpu.memory_space<vmem>>, vector<16x32xf32>
    %cst = arith.constant dense<0.000000e+00> : vector<8x32xf32>
    %2 = tpu.matmul %0, %1, %cst {dimension_numbers = #tpu.dot_dimension_numbers<[1], [0], [0], [1], [0, 0, 1, 1], [], []>} : vector<8x16xf32>, vector<16x32xf32>, vector<8x32xf32> -> vector<8x32xf32>
    %c0_3 = arith.constant 0 : index
    %c0_4 = arith.constant 0 : index
    %3 = vector.load %arg3[%c0_3, %c0_4] : memref<1x32xf32, #tpu.memory_space<vmem>>, vector<1x32xf32>
    %4 = vector.broadcast %3 : vector<1x32xf32> to vector<8x32xf32>
    %5 = arith.addf %2, %4 : vector<8x32xf32>
    %cst_5 = arith.constant 0.000000e+00 : f32
    %6 = vector.broadcast %cst_5 : f32 to vector<8x32xf32>
    %7 = arith.maximumf %5, %6 : vector<8x32xf32>
    %c0_6 = arith.constant 0 : index
    %c0_7 = arith.constant 0 : index
    %8 = vector.load %arg4[%c0_6, %c0_7] : memref<32x16xf32, #tpu.memory_space<vmem>>, vector<32x16xf32>
    %cst_8 = arith.constant dense<0.000000e+00> : vector<8x16xf32>
    %9 = tpu.matmul %7, %8, %cst_8 {dimension_numbers = #tpu.dot_dimension_numbers<[1], [0], [0], [1], [0, 0, 1, 1], [], []>} : vector<8x32xf32>, vector<32x16xf32>, vector<8x16xf32> -> vector<8x16xf32>
    %c0_9 = arith.constant 0 : index
    %c0_10 = arith.constant 0 : index
    %10 = vector.load %arg5[%c0_9, %c0_10] : memref<1x16xf32, #tpu.memory_space<vmem>>, vector<1x16xf32>
    %11 = vector.broadcast %10 : vector<1x16xf32> to vector<8x16xf32>
    %12 = arith.addf %9, %11 : vector<8x16xf32>
    %13 = arith.addf %12, %0 : vector<8x16xf32>
    %cst_11 = arith.constant dense<0.000000e+00> : vector<8xf32>
    %14 = vector.multi_reduction <add>, %13, %cst_11 [1] : vector<8x16xf32> to vector<8xf32>
    %15 = vector.shape_cast %14 : vector<8xf32> to vector<8x1xf32>
    %cst_12 = arith.constant 1.600000e+01 : f32
    %16 = vector.broadcast %cst_12 : f32 to vector<8x1xf32>
    %17 = arith.divf %15, %16 : vector<8x1xf32>
    %18 = vector.broadcast %17 : vector<8x1xf32> to vector<8x16xf32>
    %19 = arith.subf %13, %18 : vector<8x16xf32>
    %20 = arith.mulf %19, %19 : vector<8x16xf32>
    %cst_13 = arith.constant dense<0.000000e+00> : vector<8xf32>
    %21 = vector.multi_reduction <add>, %20, %cst_13 [1] : vector<8x16xf32> to vector<8xf32>
    %22 = vector.shape_cast %21 : vector<8xf32> to vector<8x1xf32>
    %cst_14 = arith.constant 1.600000e+01 : f32
    %23 = vector.broadcast %cst_14 : f32 to vector<8x1xf32>
    %24 = arith.divf %22, %23 : vector<8x1xf32>
    %25 = vector.broadcast %17 : vector<8x1xf32> to vector<8x16xf32>
    %26 = arith.subf %13, %25 : vector<8x16xf32>
    %cst_15 = arith.constant 9.99999974E-6 : f32
    %27 = vector.broadcast %cst_15 : f32 to vector<8x1xf32>
    %28 = arith.addf %24, %27 : vector<8x1xf32>
    %29 = math.rsqrt %28 : vector<8x1xf32>
    %30 = vector.broadcast %29 : vector<8x1xf32> to vector<8x16xf32>
    %31 = arith.mulf %26, %30 : vector<8x16xf32>
    %c0_16 = arith.constant 0 : index
    %c0_17 = arith.constant 0 : index
    %32 = vector.load %arg6[%c0_16, %c0_17] : memref<1x16xf32, #tpu.memory_space<vmem>>, vector<1x16xf32>
    %33 = vector.broadcast %32 : vector<1x16xf32> to vector<8x16xf32>
    %34 = arith.mulf %31, %33 : vector<8x16xf32>
    %c0_18 = arith.constant 0 : index
    %c0_19 = arith.constant 0 : index
    %35 = vector.load %arg7[%c0_18, %c0_19] : memref<1x16xf32, #tpu.memory_space<vmem>>, vector<1x16xf32>
    %36 = vector.broadcast %35 : vector<1x16xf32> to vector<8x16xf32>
    %37 = arith.addf %34, %36 : vector<8x16xf32>
    %c0_20 = arith.constant 0 : index
    %c0_21 = arith.constant 0 : index
    %38 = vector.load %arg8[%c0_20, %c0_21] : memref<8x16xf32, #tpu.memory_space<vmem>>, vector<8x16xf32>
    tpu.vector_store %arg8[%c0_20, %c0_21], %37 {strides = array<i32>} : memref<8x16xf32, #tpu.memory_space<vmem>>, vector<8x16xf32>,
    return
  }
  func.func @transform_0(%arg0: i32) -> (i32, i32) {
    %c0_i32 = arith.constant 0 : i32
    %c0_i32_0 = arith.constant 0 : i32
    return %arg0, %c0_i32 : i32, i32
  }
  func.func @transform_1(%arg0: i32) -> (i32, i32) {
    %c0_i32 = arith.constant 0 : i32
    %c0_i32_0 = arith.constant 0 : i32
    %c0_i32_1 = arith.constant 0 : i32
    return %c0_i32, %c0_i32_0 : i32, i32
  }
  func.func @transform_2(%arg0: i32) -> (i32, i32) {
    %c0_i32 = arith.constant 0 : i32
    %c0_i32_0 = arith.constant 0 : i32
    %c0_i32_1 = arith.constant 0 : i32
    return %c0_i32, %c0_i32_0 : i32, i32
  }
  func.func @transform_3(%arg0: i32) -> (i32, i32) {
    %c0_i32 = arith.constant 0 : i32
    %c0_i32_0 = arith.constant 0 : i32
    %c0_i32_1 = arith.constant 0 : i32
    return %c0_i32, %c0_i32_0 : i32, i32
  }
  func.func @transform_4(%arg0: i32) -> (i32, i32) {
    %c0_i32 = arith.constant 0 : i32
    %c0_i32_0 = arith.constant 0 : i32
    %c0_i32_1 = arith.constant 0 : i32
    return %c0_i32, %c0_i32_0 : i32, i32
  }
  func.func @transform_5(%arg0: i32) -> (i32, i32) {
    %c0_i32 = arith.constant 0 : i32
    %c0_i32_0 = arith.constant 0 : i32
    %c0_i32_1 = arith.constant 0 : i32
    return %c0_i32, %c0_i32_0 : i32, i32
  }
  func.func @transform_6(%arg0: i32) -> (i32, i32) {
    %c0_i32 = arith.constant 0 : i32
    %c0_i32_0 = arith.constant 0 : i32
    %c0_i32_1 = arith.constant 0 : i32
    return %c0_i32, %c0_i32_0 : i32, i32
  }
  func.func @transform_7(%arg0: i32) -> (i32, i32) {
    %c0_i32 = arith.constant 0 : i32
    %c0_i32_0 = arith.constant 0 : i32
    return %arg0, %c0_i32 : i32, i32
  }
}

</mosaic_0001>

<bundles_post_ra>
// kernel: tpu_custom_call.1
= control target key start
LH: loop header
LB: loop body
LE: loop exit
PB: predicated region body
PF: predicated region fallthrough
CT: control target
= control target key end

     0   :  { %12 = vsyncpa [#allocation3], 0  ;;  %s886_s0 = inlined_call_operand.vmem [shape: f32[16,16], index: 0, kind: input, shape index: {}]   ;;  %s887_s1 = inlined_call_operand.vmem [shape: f32[16,32], index: 1, kind: input, shape index: {}]   ;;  %s888_s2 = inlined_call_operand.vmem [shape: f32[1,32], index: 2, kind: input, shape index: {}]   ;;  %s889_s3 = inlined_call_operand.vmem [shape: f32[32,16], index: 3, kind: input, shape index: {}]   ;;  %s890_s4 = inlined_call_operand.vmem [shape: f32[1,16], index: 4, kind: input, shape index: {}]   ;;  %s891_s5 = inlined_call_operand.vmem [shape: f32[1,16], index: 5, kind: input, shape index: {}]   ;;  %s892_s6 = inlined_call_operand.vmem [shape: f32[1,16], index: 6, kind: input, shape index: {}]   ;;  %s893_s7 = inlined_call_operand.hbm [shape: f32[16,16], index: 7, kind: output, shape index: {}]  }
   0x1   :  { %14 = vsyncpa [#allocation3 + $0x1], 0  ;;  %s752_s24 = smov 0   ;;  %s754_s25 = smov 0  }
   0x2   :  { %s756_s26 = smov 0   ;;  %s758_s27 = smov 0  }
   0x3 LB: > { %s773_s28 = sadd.s32 4294967295, %s706_s27   ;;  %s549_s29 = sadd.s32 4294967294, %s706_s27   ;;  %s706_s27 = sphi %s758_s27, %s899_s27   ;;  %s702_s26 = sphi %s756_s26, %s898_s26   ;;  %s698_s25 = sphi %s754_s25, %s897_s25   ;;  %s694_s24 = sphi %s752_s24, %s896_s24  }
   0x4   : > { %s777_s30 = sadd.s32 1, %s706_s27   ;;  %s179_s8 = sadd.s32 1, %s702_s26 }
   0x5   : > { %s176_s9 = ssub.s32 %s706_s27, %s777_s30  ;;  %p189_p0 = scmp.ne.s32.totalorder %s702_s26, %s698_s25 }
   0x6   : > { %p177_p1 = scmp.eq.s32.totalorder %s176_s9, 0  ;;  %p190_p2 = scmp.eq.s32.totalorder %s773_s28, 1 }
   0x7   : > { %p195_p3 = scmp.ne.s32.totalorder %s698_s25, %s694_s24  ;;  %p196_p4 = scmp.eq.s32.totalorder %s549_s29, 1 }
   0x8   : > { %s788_s10 = scalar_select %p177_p1, %s702_s26, %s179_s8  }
   0x9   : > { %p790_p5 = por %p190_p2, %p189_p0  ;;  %p794_p6 = por %p196_p4, %p195_p3 }
   0xa   : > { %p552_p7 = scmp.ge.s32.totalorder %s706_s27, 1  ;;  %p239_p8 = scmp.lt.s32.totalorder %s706_s27, 3 }
   0xc   : > { %p240_p9 = pnand %p552_p7, %p239_p8 }
   0xd   : > { %v275_v0 = vld [vmem:[%s887_s1] sm:$0xff] (!%p240_p9)  ;;  %v276_v1 = vld [vmem:[%s887_s1 + $0x8] sm:$0xff] (!%p240_p9)  ;;  %p270_p10 = scmp.lt.s32.totalorder (!%p240_p9), %s773_s28, 1  ;;  %v708_v2 = vmov (!%p240_p9), 0.0|0.0   ;;  %vm709_vm0 = vmmov (!%p240_p9), 0   ;;  %v710_v4 = vmov (!%p240_p9), 0.0  }
   0xe   : > { %243 = sbr.rel (%p240_p9) target bundleno = 785 (0x311), region = 48  ;;  %591 = vmatprep.subr.bf16.mxu0 (!%p240_p9), %v708_v2  ;;  %v592_v3 = vpack.c.bf16 (!%p240_p9), %v276_v1, %v275_v0  ;;  %577 = vmatprep.mubr.msk.f32.mxu0 (!%p240_p9), %vm709_vm0, %v710_v4  ;;  %v359_v5 = vld [vmem:[%s889_s3] sm:$0xff] (!%p240_p9)  ;;  %v360_v6 = vld [vmem:[%s889_s3 + $0x8] sm:$0xff] (!%p240_p9)  ;;  %vm284_vm1 = vcmask (!%p240_p9), 130048   ;;  %v361_v9 = vld [vmem:[%s889_s3 + $0x10] sm:$0xff] (!%p240_p9)  ;;  %vm370_vm2 = vcmask (!%p240_p9), 261120  }
   0xf   : > { %594 = vmatprep.subr.bf16.mxu1 (!%p240_p9), %v708_v2  ;;  %v595_v7 = vpack.c.bf16 (!%p240_p9), %v360_v6, %v359_v5  ;;  %588 = vmatprep.mubr.msk.f32.mxu1 (!%p240_p9), %vm709_vm0, %v710_v4  ;;  %v362_v10 = vld [vmem:[%s889_s3 + $0x18] sm:$0xff] (!%p240_p9)  ;;  %v555_v12 = vld [vmem:[%s888_s2] ss:$0 sm:$0xff] (!%p240_p9)  ;;  %s267_s20 = sand.u32 (!%p240_p9), 1, %s698_s25   ;;  %s562_s9 = sshll.u32 (!%p240_p9), %s773_s28, 7 }
  0x10   : > { %593 = vmatpush3.bf16.msra.mxu0 (!%p240_p9), %v592_v3  ;;  %v598_v11 = vpack.c.bf16 (!%p240_p9), %v362_v10, %v361_v9  ;;  %v557_v17 = vld [vmem:[%s890_s4] ss:$0 sm:$0xff] (!%p240_p9)  ;;  %s843_s17 = scalar_lea.hbm (!%p240_p9), %s893_s7, %s562_s9  ;;  %s477_s18 = scalar_lea.sflag (!%p240_p9), [#allocation3], %s267_s20 }
  0x11   : > { %596 = vmatpush3.bf16.msra.mxu1 (!%p240_p9), %v595_v7  ;;  %v559_v32 = vld [vmem:[%s891_s5] ss:$0 sm:$0xff] (!%p240_p9) }
  0x12   : > { %597 = vmatprep.subr.bf16.mxu1 (!%p240_p9), %v708_v2  ;;  %v560_v34 = vld [vmem:[%s892_s6] ss:$0 sm:$0xff] (!%p240_p9) }
  0x15   : > { %s271_s21 = scalar_select %p270_p10, %s773_s28, 1  ;;  %599 = vmatpush3.bf16.msra.mxu1 %v598_v11 }
  0x16   : > { %s711_s28 = smov [#allocation2]  }
  0x17   : > { %s554_s22 = sshll.u32 %s271_s21, 3  ;;  %s553_s21 = sshll.u32 %s267_s20, 3 }
  0x18   : > { %s273_s8 = scalar_lea.vmem %s886_s0, %s554_s22  ;;  %s269_s13 = scalar_lea.vmem [#allocation2], %s553_s21 }
  0x19   : > { %v274_v8 = vld [vmem:[%s273_s8] sm:$0xff]  ;;  %s490_s14 = sshll.u32 %s269_s13, 4  ;;  %s648_s21 = sshll.u32 %s711_s28, 4  ;;  %s845_s14 = int_to_ptr.vmem [resolvable:$true] %s490_s14  ;;  %s649_s21 = int_to_ptr.vmem [resolvable:$false] %s648_s21 }
  0x1a   : > { %578 = vmatmul.mubr.msk.f32.vlgmr.msra.gmra.mrb[0].mxu0 %vm284_vm1, %v274_v8  ;;  %s644_s19 = scalar_lea.vmem %s845_s14, 128  ;;  %s650_s22 = scalar_lea.vmem %s649_s21, 256 }
  0x1b   : > { %p645_p11 = scmp.ne.s32.totalorder %s845_s14, %s644_s19  ;;  %p651_p0 = scmp.lt.s32.totalorder %s845_s14, %s649_s21 }
  0x1c   : > { %p652_p1 = scmp.lt.s32.totalorder %s650_s22, %s644_s19 }
  0x1d   : > { %p646_p12 = pnand %p645_p11, %p790_p5 }
  0x1e   : > { %p653_p2 = por %p652_p1, %p651_p0 }
  0x1f   : > { %p647_p13 = pneg %p646_p12 }
  0x21   : > { %p654_p3 = pnand %p653_p2, %p647_p13 }
  0xed   : > { %v354_v13 = vpop.f32.mrb[0].mxu0 }
  0xee   : > { %v355_v14 = vadd.f32 %v555_v12, %v354_v13  ;;  %v579_v15 = vpop.f32.mrb[1].mxu0 }
  0xf0   : > { %v358_v16 = vmax.f32 %v355_v14, 0.0 }
  0xf2   : > { %589 = vmatmul.mubr.msk.f32.vlgmr.msra.gmra.mrb[0].mxu1 %vm370_vm2, %v358_v16 }
 0x1c5   : > { %v440_v18 = vpop.f32.mrb[0].mxu1 }
 0x1c6   : > { %v441_v19 = vadd.f32 %v557_v17, %v440_v18  ;;  %v590_v20 = vpop.f32.mrb[1].mxu1 }
 0x1c8   : > { %v444_v21 = vadd.f32 %v441_v19, %v274_v8 }
 0x1ca   : > { %v445_v22 = vsel %vm284_vm1, %v444_v21, 0.0 }
 0x1cb   : > { %446 = vadd.xlane.f32.xlu0 %v445_v22 }
 0x258   : > { %v447_v23 = vpop.xlane.xlu0 %446 }
 0x259   : > { %v449_v24 = vmul.f32 0.0625, %v447_v23 }
 0x25b   : > { %v450_v25 = vsub.f32 %v444_v21, %v449_v24 }
 0x25d   : > { %v451_v26 = vmul.f32 %v450_v25, %v450_v25 }
 0x25f   : > { %v452_v27 = vsel %vm284_vm1, %v451_v26, 0.0 }
 0x260   : > { %453 = vadd.xlane.f32.xlu0 %v452_v27 }
 0x2ed   : > { %v454_v28 = vpop.xlane.xlu0 %453 }
 0x2ee   : > { %v455_v29 = vmul.f32 0.0625, %v454_v28 }
 0x2f0   : > { %v456_v30 = vadd.f32 1e-05, %v455_v29 }
 0x2f2   : > { %642 = vrsqrt.f32 %v456_v30 }
 0x2fc   : > { %v643_v31 = vpop.eup %642 }
 0x2fd   : > { %v458_v33 = vmul.f32 %v643_v31, %v450_v25 }
 0x2ff   : > { %v466_v35 = vmul.f32 %v559_v32, %v458_v33 }
 0x301   : > { %v474_v36 = vadd.f32 %v560_v34, %v466_v35 }
 0x303   : > { %475 = vst.msk [vmem:[%s269_s13] sm:$0xff] %vm284_vm1, %v474_v36 }
 0x304   : > { %657 = shalt.err (!%p654_p3)
}
 0x305   : > { %s658_s20 = scalar_lea.hbm %s843_s17, 128  ;;  %s662_s8 = scalar_lea.hbm %s893_s7, 256 }
 0x306   : > { %p659_p4 = scmp.ne.s32.totalorder %s843_s17, %s658_s20  ;;  %p663_p9 = scmp.lt.u32.totalorder %s843_s17, %s893_s7 }
 0x307   : > { %p664_p10 = scmp.lt.u32.totalorder %s662_s8, %s658_s20  ;;  %p666_p12 = scmp.lt.u32.totalorder %s658_s20, %s843_s17 }
 0x308   : > { %p660_p7 = pnand %p659_p4, %p790_p5 }
 0x309   : > { %p665_p11 = por %p664_p10, %p663_p9 }
 0x30a   : > { %p661_p8 = pneg %p660_p7 }
 0x30b   : > { %p667_p13 = por %p666_p12, %p665_p11 }
 0x30d   : > { %p668_p0 = pnand %p667_p13, %p661_p8 }
 0x30f   : > { %671 = shalt.err (!%p668_p0)
}
 0x310   : > { %600 = dma.vmem_to_hbm [thread:$0]  (%p790_p5), %s845_s14, 128, %s843_s17, %s477_s18  }
 0x311 PF: > { %p606_p1 = scmp.ge.s32.totalorder %s706_s27, 2  ;;  %s502_s15 = sand.u32 1, %s694_s24  }
 0x312   : > { %s503_s16 = scalar_lea.sflag [#allocation3], %s502_s15 }
 0x313   : > { %p603_p2 = pnand %p606_p1, %p794_p6 }
 0x315   : > { %689 = dma.done.wait (!%p603_p2), %s503_s16, 128  }
 0x316   : > { %691 = vsyncadd (!%p603_p2), %s503_s16, 4294967168  ;;  %p17_p3 = scmp.ge.s32.totalorder %s777_s30, 4   ;;  %s896_s24 = smov %s698_s25 }
 0x317   : > { %s897_s25 = smov %s702_s26  ;;  %s898_s26 = smov %s788_s10 }
 0x318   : > { %s899_s27 = smov %s777_s30  ;;  %19 = sbr.rel (!%p17_p3) target bundleno = 3 (0x3), region = 83 }
 0x31f   :  { %508 = vsyncpa [#allocation3], 1 }
 0x320   :  { %510 = vsyncpa [#allocation3 + $0x1], 1 }

</bundles_post_ra>
